<compile_context>
chip_gen: v6e
topology: v6e:2x2x1
jax: 0.10.0
libtpu: 0.0.40
codegen_flags: <defaults>
</compile_context>

<pallas_src>
import jax
import jax.numpy as jnp
from jax import lax
from jax.experimental import pallas as pl
from jax.experimental.pallas import tpu as pltpu


def mlp_kernel(x_ref, w1t_ref, w2t_ref, w3_ref, o_ref):
    # x:   (bt, D)  bf16
    # w1t: (D, D)   bf16   (pre-transposed: contract on dim 0)
    # w2t: (D, H)   bf16   (pre-transposed)
    # w3:  (1, H)   bf16   (torch row layout, contracted on its dim 1)
    x = x_ref[...]

    # linear_1 + ReLU: MXU matmul, f32 accumulate; ReLU on the VPU in f32.
    h1 = jnp.dot(x, w1t_ref[...], preferred_element_type=jnp.float32)
    h1 = jnp.maximum(h1, 0.0).astype(jnp.bfloat16)

    # linear_2 + ReLU.
    h2 = jnp.dot(h1, w2t_ref[...], preferred_element_type=jnp.float32)
    h2 = jnp.maximum(h2, 0.0).astype(jnp.bfloat16)

    # linear_3 (single output unit), lane-dense: contract (1,H) with (bt,H) on
    # their last dims -> (1, bt).  The result is already one sublane row x bt
    # lanes, so the store below is an unmasked, lane-dense vst.
    s = lax.dot_general(w3_ref[...], h2, (((1,), (1,)), ((), ())),
                        preferred_element_type=jnp.float32)

    # Sigmoid on the EUP in f32, cast to output dtype.
    o_ref[...] = jax.nn.sigmoid(s).astype(o_ref.dtype)


def _choose_bt(B: int) -> int:
    """Batch tile.  Large tiles amortize the ~0.35us per-grid-step overhead
    (mem-bound roofline knee ~512-1024 rows); when B allows, keep >=2 grid
    steps so the 'parallel' batch axis shards across v7x's two TensorCores.
    Every returned tile satisfies the (8,128) BlockSpec rule (either the full
    batch extent or a multiple of 128)."""
    cap = 1024
    if B > cap:
        return cap                 # >=2 steps, 128-aligned tiles
    if B >= 256 and B % 256 == 0:
        return B // 2              # exactly 2 steps, each 128-aligned (v7x)
    return B                       # single resident tile (full extent)


def _mlp_pallas(x, w1, w2, w3):
    """x: (B, D); torch-layout weights w1: (D, D), w2: (D//2, D), w3: (1, D//2)."""
    B, D = x.shape
    H = w2.shape[0]  # D // 2

    # One-time relayout / downcast outside the kernel (tiny XLA ops):
    #  - (out, in) -> (in, out) so the kernel contracts on dim 0 (no chance of
    #    a per-step in-kernel transpose of the resident weights),
    #  - bf16 for the HBM stream and MXU inputs.
    xb = x.astype(jnp.bfloat16)
    w1t = w1.T.astype(jnp.bfloat16)          # (D, D)
    w2t = w2.T.astype(jnp.bfloat16)          # (D, H)
    w3b = w3.astype(jnp.bfloat16)            # (1, H)

    bt = _choose_bt(B)
    grid = (pl.cdiv(B, bt),)

    out = pl.pallas_call(
        mlp_kernel,
        out_shape=jax.ShapeDtypeStruct((1, B), jnp.float32),
        grid=grid,
        in_specs=[
            pl.BlockSpec((bt, D), lambda i: (i, 0)),   # x streams over batch
            pl.BlockSpec((D, D), lambda i: (0, 0)),    # weights: constant block
            pl.BlockSpec((D, H), lambda i: (0, 0)),    #   index -> VMEM-resident
            pl.BlockSpec((1, H), lambda i: (0, 0)),
        ],
        out_specs=pl.BlockSpec((1, bt), lambda i: (0, i)),  # lane-dense output row
        compiler_params=pltpu.CompilerParams(
            dimension_semantics=("parallel",)),        # batch axis shards across TCs
    )(xb, w1t, w2t, w3b)

    # torch.squeeze removes all size-1 dims: (1, B) -> (B,)  ((1,1) -> scalar
    # when B == 1, matching torch.squeeze).
    return jnp.squeeze(out)


mlp_forward = jax.jit(_mlp_pallas)


if __name__ == "__main__":
    key = jax.random.PRNGKey(0)
    B, D = 8, 32  # batch=8, input_size=32 (small, consistent with the module)

    kx, k1, k2, k3 = jax.random.split(key, 4)
    x = jax.random.normal(kx, (B, D), dtype=jnp.float32)

    # Deterministic "Kaiming-uniform-like" init, torch Linear weight shapes (out, in).
    def init_w(k, out_f, in_f):
        bound = 1.0 / jnp.sqrt(in_f)
        return jax.random.uniform(k, (out_f, in_f), jnp.float32, -bound, bound)

    w1 = init_w(k1, D, D)          # linear_1: (D, D)
    w2 = init_w(k2, D // 2, D)     # linear_2: (D//2, D)
    w3 = init_w(k3, 1, D // 2)     # linear_3: (1, D//2)

    y = mlp_forward(x, w1, w2, w3)
    jax.block_until_ready(y)

    # Reference 1: same bf16-operand / f32-accumulate math as the kernel.
    def ref_bf16(x, w1, w2, w3):
        xb = x.astype(jnp.bfloat16)
        h1 = jnp.dot(xb, w1.T.astype(jnp.bfloat16),
                     preferred_element_type=jnp.float32)
        h1 = jnp.maximum(h1, 0.0).astype(jnp.bfloat16)
        h2 = jnp.dot(h1, w2.T.astype(jnp.bfloat16),
                     preferred_element_type=jnp.float32)
        h2 = jnp.maximum(h2, 0.0).astype(jnp.bfloat16)
        s = jnp.dot(h2, w3.T.astype(jnp.bfloat16),
                    preferred_element_type=jnp.float32)
        return jnp.squeeze(jax.nn.sigmoid(s))

    # Reference 2: the original module's pure-f32 forward.
    def ref_f32(x, w1, w2, w3):
        h = jnp.maximum(x @ w1.T, 0.0)
        h = jnp.maximum(h @ w2.T, 0.0)
        return jnp.squeeze(jax.nn.sigmoid(h @ w3.T))

    assert y.shape == (B,), y.shape
    assert jnp.allclose(y, ref_bf16(x, w1, w2, w3), atol=1e-4, rtol=1e-4)
    assert jnp.allclose(y, ref_f32(x, w1, w2, w3), atol=2e-2, rtol=2e-2)

    print("KERNEL_OK")
</pallas_src>

<mosaic_0001>
module attributes {stable_mosaic.version = 11 : i64} {
  func.func @mlp_kernel(%arg0: i32, %arg1: memref<8x32xbf16, #tpu.memory_space<vmem>>, %arg2: memref<32x32xbf16, #tpu.memory_space<vmem>>, %arg3: memref<32x16xbf16, #tpu.memory_space<vmem>>, %arg4: memref<1x16xbf16, #tpu.memory_space<vmem>>, %arg5: memref<1x8xf32, #tpu.memory_space<vmem>>) attributes {dimension_semantics = [#tpu.dimension_semantics<parallel>], iteration_bounds = array<i64: 1>, scalar_prefetch = 0 : i64, scratch_operands = 0 : i64, tpu.core_type = #tpu.core_type<tc>, window_params = [{transform_indices = @transform_0, window_bounds = array<i64: 8, 32>}, {pipeline_mode = #tpu.pipeline_mode<synchronous>, transform_indices = @transform_1, window_bounds = array<i64: 32, 32>}, {pipeline_mode = #tpu.pipeline_mode<synchronous>, transform_indices = @transform_2, window_bounds = array<i64: 32, 16>}, {pipeline_mode = #tpu.pipeline_mode<synchronous>, transform_indices = @transform_3, window_bounds = array<i64: 1, 16>}, {transform_indices = @transform_4, window_bounds = array<i64: 1, 8>}]} {
    %c0 = arith.constant 0 : index
    %c0_0 = arith.constant 0 : index
    %0 = vector.load %arg1[%c0, %c0_0] : memref<8x32xbf16, #tpu.memory_space<vmem>>, vector<8x32xbf16>
    %c0_1 = arith.constant 0 : index
    %c0_2 = arith.constant 0 : index
    %1 = vector.load %arg2[%c0_1, %c0_2] : memref<32x32xbf16, #tpu.memory_space<vmem>>, vector<32x32xbf16>
    %cst = arith.constant dense<0.000000e+00> : vector<8x32xf32>
    %2 = tpu.matmul %0, %1, %cst {dimension_numbers = #tpu.dot_dimension_numbers<[1], [0], [0], [1], [0, 0, 1, 1], [], []>} : vector<8x32xbf16>, vector<32x32xbf16>, vector<8x32xf32> -> vector<8x32xf32>
    %cst_3 = arith.constant 0.000000e+00 : f32
    %3 = vector.broadcast %cst_3 : f32 to vector<8x32xf32>
    %4 = arith.maximumf %2, %3 : vector<8x32xf32>
    %5 = arith.truncf %4 : vector<8x32xf32> to vector<8x32xbf16>
    %c0_4 = arith.constant 0 : index
    %c0_5 = arith.constant 0 : index
    %6 = vector.load %arg3[%c0_4, %c0_5] : memref<32x16xbf16, #tpu.memory_space<vmem>>, vector<32x16xbf16>
    %cst_6 = arith.constant dense<0.000000e+00> : vector<8x16xf32>
    %7 = tpu.matmul %5, %6, %cst_6 {dimension_numbers = #tpu.dot_dimension_numbers<[1], [0], [0], [1], [0, 0, 1, 1], [], []>} : vector<8x32xbf16>, vector<32x16xbf16>, vector<8x16xf32> -> vector<8x16xf32>
    %cst_7 = arith.constant 0.000000e+00 : f32
    %8 = vector.broadcast %cst_7 : f32 to vector<8x16xf32>
    %9 = arith.maximumf %7, %8 : vector<8x16xf32>
    %10 = arith.truncf %9 : vector<8x16xf32> to vector<8x16xbf16>
    %c0_8 = arith.constant 0 : index
    %c0_9 = arith.constant 0 : index
    %11 = vector.load %arg4[%c0_8, %c0_9] : memref<1x16xbf16, #tpu.memory_space<vmem>>, vector<1x16xbf16>
    %cst_10 = arith.constant dense<0.000000e+00> : vector<1x8xf32>
    %12 = tpu.matmul %11, %10, %cst_10 {dimension_numbers = #tpu.dot_dimension_numbers<[1], [1], [0], [0], [0, 0, 1, 0], [], []>} : vector<1x16xbf16>, vector<8x16xbf16>, vector<1x8xf32> -> vector<1x8xf32>
    %13 = arith.negf %12 : vector<1x8xf32>
    %14 = math.exp %13 : vector<1x8xf32>
    %cst_11 = arith.constant 1.000000e+00 : f32
    %15 = vector.broadcast %cst_11 : f32 to vector<1x8xf32>
    %16 = arith.addf %15, %14 : vector<1x8xf32>
    %17 = arith.divf %15, %16 : vector<1x8xf32>
    %c0_12 = arith.constant 0 : index
    %c0_13 = arith.constant 0 : index
    %18 = vector.load %arg5[%c0_12, %c0_13] : memref<1x8xf32, #tpu.memory_space<vmem>>, vector<1x8xf32>
    tpu.vector_store %arg5[%c0_12, %c0_13], %17 {strides = array<i32>} : memref<1x8xf32, #tpu.memory_space<vmem>>, vector<1x8xf32>,
    return
  }
  func.func @transform_0(%arg0: i32) -> (i32, i32) {
    %c0_i32 = arith.constant 0 : i32
    %c0_i32_0 = arith.constant 0 : i32
    return %arg0, %c0_i32 : i32, i32
  }
  func.func @transform_1(%arg0: i32) -> (i32, i32) {
    %c0_i32 = arith.constant 0 : i32
    %c0_i32_0 = arith.constant 0 : i32
    %c0_i32_1 = arith.constant 0 : i32
    return %c0_i32, %c0_i32_0 : i32, i32
  }
  func.func @transform_2(%arg0: i32) -> (i32, i32) {
    %c0_i32 = arith.constant 0 : i32
    %c0_i32_0 = arith.constant 0 : i32
    %c0_i32_1 = arith.constant 0 : i32
    return %c0_i32, %c0_i32_0 : i32, i32
  }
  func.func @transform_3(%arg0: i32) -> (i32, i32) {
    %c0_i32 = arith.constant 0 : i32
    %c0_i32_0 = arith.constant 0 : i32
    %c0_i32_1 = arith.constant 0 : i32
    return %c0_i32, %c0_i32_0 : i32, i32
  }
  func.func @transform_4(%arg0: i32) -> (i32, i32) {
    %c0_i32 = arith.constant 0 : i32
    %c0_i32_0 = arith.constant 0 : i32
    return %c0_i32, %arg0 : i32, i32
  }
}

</mosaic_0001>

<bundles_post_ra>
// kernel: _mlp_pallas.1
= control target key start
LH: loop header
LB: loop body
LE: loop exit
PB: predicated region body
PF: predicated region fallthrough
CT: control target
= control target key end

     0   :  { %v284_v1 = vmov 0.0   ;;  %vm285_vm0 = vmmov 0   ;;  %s333_s0 = inlined_call_operand.vmem [shape: bf16[8,32], index: 0, kind: input, shape index: {}]   ;;  %s334_s1 = inlined_call_operand.vmem [shape: bf16[32,32], index: 1, kind: input, shape index: {}]   ;;  %s335_s2 = inlined_call_operand.vmem [shape: bf16[32,16], index: 2, kind: input, shape index: {}]   ;;  %s336_s3 = inlined_call_operand.vmem [shape: bf16[1,16], index: 3, kind: input, shape index: {}]   ;;  %s337_s4 = inlined_call_operand.hbm [shape: f32[1,8], index: 4, kind: output, shape index: {}]  }
   0x1   :  { %v254_v0 = vld [vmem:[%s334_s1 + $0x8] sm:$0xff]   ;;  %229 = vmatprep.subr.bf16.mxu0 %v284_v1  ;;  %237 = vmatprep.subr.bf16.mxu1 %v284_v1  ;;  %v255_v2 = vld [vmem:[%s334_s1] sm:$0xff]  }
   0x2   :  { %230 = vmatpush3.bf16.msra.mxu0 %v254_v0  ;;  %233 = vmatprep.mubr.msk.bf16.mxu0 %vm285_vm0, %v284_v1  ;;  %v256_v3 = vld [vmem:[%s335_s2 + $0x8] sm:$0xff]  }
   0x3   :  { %231 = vmatprep.subr.bf16.mxu0 %v284_v1  ;;  %241 = vmatprep.mubr.msk.bf16.mxu1 %vm285_vm0, %v284_v1 }
   0x4   :  { %238 = vmatpush3.bf16.msra.mxu1 %v256_v3 }
   0x5   :  { %9 = vsyncpa [#allocation3], 0  ;;  %239 = vmatprep.subr.bf16.mxu1 %v284_v1  ;;  %v19_v4 = vld [vmem:[%s333_s0] sm:$0xf]  ;;  %vm36_vm1 = vcmask 261120   ;;  %vm144_vm2 = vcmask 130048  }
   0x6   :  { %232 = vmatpush3.bf16.msra.mxu0 %v255_v2  ;;  %v257_v5 = vld [vmem:[%s335_s2] sm:$0xff]   ;;  %s286_s2 = smov [#allocation2]   ;;  %vm197_vm3 = vcmask 57344  }
   0x7   :  { %245 = vmatprep.subr.bf16.mxu0 %v284_v1  ;;  %v143_v19 = vld [vmem:[%s336_s3] sm:$0x1]  ;;  %s205_s25 = sshll.u32 %s286_s2, 4  ;;  %s206_s25 = int_to_ptr.vmem [resolvable:$true] %s205_s25 }
   0x8   :  { %240 = vmatpush3.bf16.msra.mxu1 %v257_v5  ;;  %s262_s26 = scalar_lea.vmem %s206_s25, 16  ;;  %s266_s27 = scalar_lea.vmem %s206_s25, 32 }
   0x9   :  { %234 = vmatmul.mubr.msk.bf16.vlgmr.msra.gmra.mxu0 %vm36_vm1, %v19_v4  ;;  %p263_p0 = scmp.ne.s32.totalorder %s206_s25, %s262_s26  ;;  %p267_p1 = scmp.lt.s32.totalorder %s206_s25, %s206_s25 }
   0xa   :  { %247 = vmatprep.mubr.msk.bf16.mxu0 %vm285_vm0, %v284_v1  ;;  %p268_p2 = scmp.lt.s32.totalorder %s266_s27, %s262_s26 }
   0xc   :  { %p269_p3 = por %p268_p2, %p267_p1 }
   0xe   :  { %p270_p4 = pnand %p269_p3, %p263_p0 }
  0xc9   :  { %v74_v6 = vpop.f32.mrf.mxu0 }
  0xca   :  { %v80_v7 = vmax.f32 %v74_v6, 0.0 }
  0xcb   :  { %v235_v8 = vpop.f32.mrf.mxu0 }
  0xcc   :  { %v81_v9 = vpack.c.bf16 %v80_v7, %v80_v7 }
  0xcd   :  { %v77_v10 = vpop.f32.mrf.mxu0 }
  0xce   :  { %242 = vmatmul.mubr.msk.bf16.vlgmr.msra.gmra.mxu1 %vm36_vm1, %v81_v9 }
  0xcf   :  { %v236_v11 = vpop.f32.mrf.mxu0 }
 0x18e   :  { %v135_v12 = vpop.f32.mrf.mxu1 }
 0x18f   :  { %v141_v13 = vmax.f32 %v135_v12, 0.0 }
 0x190   :  { %v243_v14 = vpop.f32.mrf.mxu1 }
 0x191   :  { %v142_v15 = vpack.c.bf16 %v141_v13, %v141_v13 }
 0x192   :  { %v138_v16 = vpop.f32.mrf.mxu1 }
 0x193   :  { %v149_v17 = vsel %vm144_vm2, %v142_v15, 0 }
 0x194   :  { %v244_v18 = vpop.f32.mrf.mxu1  ;;  %246 = vmatpush3.bf16.xpose.msra.mxu0 %v149_v17 }
 0x19b   :  { %248 = vmatmul.mubr.msk.bf16.vlgmr.msra.gmra.mxu0 %vm144_vm2, %v143_v19 }
 0x25b   :  { %v185_v20 = vpop.f32.mrf.mxu0 }
 0x25c   :  { %v220_v21 = vmul.f32 -1.442695, %v185_v20 }
 0x25d   :  { %v249_v22 = vpop.f32.mrf.mxu0 }
 0x25e   :  { %258 = vpow2.f32 %v220_v21 }
 0x25f   :  { %v188_v23 = vpop.f32.mrf.mxu0 }
 0x261   :  { %v250_v24 = vpop.f32.mrf.mxu0 }
 0x26b   :  { %v259_v25 = vpop.eup %258 }
 0x26c   :  { %v194_v26 = vadd.f32 1.0, %v259_v25 }
 0x26e   :  { %260 = vrcp.f32 %v194_v26 }
 0x27b   :  { %v261_v27 = vpop.eup %260 }
 0x27c   :  { %198 = vst.msk [vmem:[#allocation2] sm:$0x1] %vm197_vm3, %v261_v27 }
 0x27d   :  { %273 = shalt.err (!%p270_p4)
}
 0x27e   :  { %208 = dma.vmem_to_hbm [thread:$0]  %s206_s25, 16, %s337_s4, [#allocation3]  }
 0x27f   :  { %282 = dma.done.wait [#allocation3], 16  }
 0x280   :  { %283 = vsyncadd [#allocation3], 4294967280 }
 0x281   :  { %212 = vsyncpa [#allocation3], 1 }

</bundles_post_ra>
